<compile_context>
chip_gen: v5e
topology: v5e:2x2
jax: 0.10.0
libtpu: 0.0.40
codegen_flags: <defaults>
</compile_context>

<pallas_src>
import jax
import jax.numpy as jnp
from jax.experimental import pallas as pl
from jax.experimental.pallas import tpu as pltpu


def _round_up(n, m):
    return ((n + m - 1) // m) * m


def _mlp_softmax_kernel(x_ref, w1_ref, b1_ref, w2_ref, b2_ref, w3_ref, b3_ref,
                        out_ref):
    x = x_ref[...]                                                    # (TB, L) bf16

    # hidden_layer1: Linear + ReLU  (bf16 matmul, f32 accumulate/elementwise)
    h1 = jnp.dot(x, w1_ref[...], preferred_element_type=jnp.float32)
    h1 = jnp.maximum(h1 + b1_ref[...], 0.0).astype(jnp.bfloat16)      # (TB, H)

    # hidden_layer2: Linear + ReLU
    h2 = jnp.dot(h1, w2_ref[...], preferred_element_type=jnp.float32)
    h2 = jnp.maximum(h2 + b2_ref[...], 0.0).astype(jnp.bfloat16)      # (TB, H)

    # output_layer: Linear (class dim padded to a lane-dense 128)
    logits = jnp.dot(h2, w3_ref[...], preferred_element_type=jnp.float32)
    logits = logits + b3_ref[...]                                     # (TB, CP)

    # softmax over classes, numerically stable; padded classes have bias
    # -1e30 so exp() underflows to exactly 0 for them.  Exact reciprocal so
    # every row sums to 1 within f32 rounding.
    m = jnp.max(logits, axis=-1, keepdims=True)
    e = jnp.exp(logits - m)
    denom = jnp.sum(e, axis=-1, keepdims=True)
    out_ref[...] = e * (1.0 / denom)


def classifier_forward(x, params, tb=128):
    """x: (B, L) float32.  params: dict of (in,out) weights and (1,out) biases."""
    B, L = x.shape
    H = params["w1"].shape[1]
    C = params["w3"].shape[1]

    CP = _round_up(C, 128)                 # lane-dense output slab
    TB = min(tb, _round_up(B, 8))          # batch tile, multiple of 8
    Bp = _round_up(B, TB)                  # padded batch

    # bf16 activations/weights (f32 accumulation on MXU); f32 biases.
    xb = x.astype(jnp.bfloat16)
    if Bp != B:
        xb = jnp.pad(xb, ((0, Bp - B), (0, 0)))
    w1 = params["w1"].astype(jnp.bfloat16)
    w2 = params["w2"].astype(jnp.bfloat16)
    w3 = jnp.pad(params["w3"], ((0, 0), (0, CP - C))).astype(jnp.bfloat16)
    b1 = params["b1"].astype(jnp.float32)
    b2 = params["b2"].astype(jnp.float32)
    b3 = jnp.pad(params["b3"].astype(jnp.float32), ((0, 0), (0, CP - C)),
                 constant_values=-1e30)    # padded classes -> softmax prob 0

    const = lambda shape: pl.BlockSpec(shape, lambda i: (0, 0))

    out = pl.pallas_call(
        _mlp_softmax_kernel,
        out_shape=jax.ShapeDtypeStruct((Bp, CP), jnp.float32),
        grid=(Bp // TB,),
        in_specs=[
            pl.BlockSpec((TB, L), lambda i: (i, 0)),   # x: tiled over batch
            const((L, H)), const((1, H)),              # w1, b1 (resident)
            const((H, H)), const((1, H)),              # w2, b2 (resident)
            const((H, CP)), const((1, CP)),            # w3, b3 (resident)
        ],
        out_specs=pl.BlockSpec((TB, CP), lambda i: (i, 0)),
        compiler_params=pltpu.CompilerParams(
            dimension_semantics=("parallel",)),
    )(xb, w1, b1, w2, b2, w3, b3)

    return out[:B, :C]


def init_params(key, input_dim, hidden_dim, num_classes):
    """Deterministic synthetic parameters (PyTorch Linear-style uniform init)."""
    ks = jax.random.split(key, 6)

    def lin(kw, kb, fan_in, fan_out):
        bound = 1.0 / jnp.sqrt(fan_in)
        # stored as (in, out) == transpose of torch's (out, in) weight
        w = jax.random.uniform(kw, (fan_in, fan_out), jnp.float32, -bound, bound)
        b = jax.random.uniform(kb, (1, fan_out), jnp.float32, -bound, bound)
        return w, b

    w1, b1 = lin(ks[0], ks[1], input_dim, hidden_dim)
    w2, b2 = lin(ks[2], ks[3], hidden_dim, hidden_dim)
    w3, b3 = lin(ks[4], ks[5], hidden_dim, num_classes)
    return dict(w1=w1, b1=b1, w2=w2, b2=b2, w3=w3, b3=b3)


def reference_forward(x, p):
    """Pure-JAX reference mirroring the kernel's bf16 weight/activation casts."""
    f32 = lambda a: a.astype(jnp.bfloat16).astype(jnp.float32)
    h1 = jnp.maximum(f32(x) @ f32(p["w1"]) + p["b1"], 0.0)
    h2 = jnp.maximum(f32(h1) @ f32(p["w2"]) + p["b2"], 0.0)
    logits = f32(h2) @ f32(p["w3"]) + p["b3"]
    return jax.nn.softmax(logits, axis=1)


if __name__ == "__main__":
    # Shapes consistent with the module: B=64 flattened 16x16 single-channel
    # images -> input_dim = L = 256, hidden_dim = 32, num_classes = 10.
    B, L, H, C = 64, 256, 32, 10

    key = jax.random.PRNGKey(0)
    kx, kp = jax.random.split(key)
    x = jax.random.normal(kx, (B, L), jnp.float32)
    params = init_params(kp, input_dim=L, hidden_dim=H, num_classes=C)

    out = classifier_forward(x, params)
    out = jax.block_until_ready(out)

    ref = reference_forward(x, params)
    assert out.shape == (B, C)
    assert jnp.allclose(out, ref, atol=2e-3, rtol=2e-3)
    assert jnp.allclose(jnp.sum(out, axis=1), 1.0, atol=2e-3)

    print("KERNEL_OK")
</pallas_src>

<mosaic_0001>
module attributes {stable_mosaic.version = 11 : i64} {
  func.func @_mlp_softmax_kernel(%arg0: i32, %arg1: memref<64x256xbf16, #tpu.memory_space<vmem>>, %arg2: memref<256x32xbf16, #tpu.memory_space<vmem>>, %arg3: memref<1x32xf32, #tpu.memory_space<vmem>>, %arg4: memref<32x32xbf16, #tpu.memory_space<vmem>>, %arg5: memref<1x32xf32, #tpu.memory_space<vmem>>, %arg6: memref<32x128xbf16, #tpu.memory_space<vmem>>, %arg7: memref<1x128xf32, #tpu.memory_space<vmem>>, %arg8: memref<64x128xf32, #tpu.memory_space<vmem>>) attributes {dimension_semantics = [#tpu.dimension_semantics<parallel>], iteration_bounds = array<i64: 1>, scalar_prefetch = 0 : i64, scratch_operands = 0 : i64, tpu.core_type = #tpu.core_type<tc>, window_params = [{transform_indices = @transform_0, window_bounds = array<i64: 64, 256>}, {pipeline_mode = #tpu.pipeline_mode<synchronous>, transform_indices = @transform_1, window_bounds = array<i64: 256, 32>}, {pipeline_mode = #tpu.pipeline_mode<synchronous>, transform_indices = @transform_2, window_bounds = array<i64: 1, 32>}, {pipeline_mode = #tpu.pipeline_mode<synchronous>, transform_indices = @transform_3, window_bounds = array<i64: 32, 32>}, {pipeline_mode = #tpu.pipeline_mode<synchronous>, transform_indices = @transform_4, window_bounds = array<i64: 1, 32>}, {pipeline_mode = #tpu.pipeline_mode<synchronous>, transform_indices = @transform_5, window_bounds = array<i64: 32, 128>}, {pipeline_mode = #tpu.pipeline_mode<synchronous>, transform_indices = @transform_6, window_bounds = array<i64: 1, 128>}, {transform_indices = @transform_7, window_bounds = array<i64: 64, 128>}]} {
    %c0 = arith.constant 0 : index
    %c0_0 = arith.constant 0 : index
    %0 = vector.load %arg1[%c0, %c0_0] : memref<64x256xbf16, #tpu.memory_space<vmem>>, vector<64x256xbf16>
    %c0_1 = arith.constant 0 : index
    %c0_2 = arith.constant 0 : index
    %1 = vector.load %arg2[%c0_1, %c0_2] : memref<256x32xbf16, #tpu.memory_space<vmem>>, vector<256x32xbf16>
    %cst = arith.constant dense<0.000000e+00> : vector<64x32xf32>
    %2 = tpu.matmul %0, %1, %cst {dimension_numbers = #tpu.dot_dimension_numbers<[1], [0], [0], [1], [0, 0, 1, 1], [], []>} : vector<64x256xbf16>, vector<256x32xbf16>, vector<64x32xf32> -> vector<64x32xf32>
    %c0_3 = arith.constant 0 : index
    %c0_4 = arith.constant 0 : index
    %3 = vector.load %arg3[%c0_3, %c0_4] : memref<1x32xf32, #tpu.memory_space<vmem>>, vector<1x32xf32>
    %4 = vector.broadcast %3 : vector<1x32xf32> to vector<64x32xf32>
    %5 = arith.addf %2, %4 : vector<64x32xf32>
    %cst_5 = arith.constant 0.000000e+00 : f32
    %6 = vector.broadcast %cst_5 : f32 to vector<64x32xf32>
    %7 = arith.maximumf %5, %6 : vector<64x32xf32>
    %8 = arith.truncf %7 : vector<64x32xf32> to vector<64x32xbf16>
    %c0_6 = arith.constant 0 : index
    %c0_7 = arith.constant 0 : index
    %9 = vector.load %arg4[%c0_6, %c0_7] : memref<32x32xbf16, #tpu.memory_space<vmem>>, vector<32x32xbf16>
    %cst_8 = arith.constant dense<0.000000e+00> : vector<64x32xf32>
    %10 = tpu.matmul %8, %9, %cst_8 {dimension_numbers = #tpu.dot_dimension_numbers<[1], [0], [0], [1], [0, 0, 1, 1], [], []>} : vector<64x32xbf16>, vector<32x32xbf16>, vector<64x32xf32> -> vector<64x32xf32>
    %c0_9 = arith.constant 0 : index
    %c0_10 = arith.constant 0 : index
    %11 = vector.load %arg5[%c0_9, %c0_10] : memref<1x32xf32, #tpu.memory_space<vmem>>, vector<1x32xf32>
    %12 = vector.broadcast %11 : vector<1x32xf32> to vector<64x32xf32>
    %13 = arith.addf %10, %12 : vector<64x32xf32>
    %cst_11 = arith.constant 0.000000e+00 : f32
    %14 = vector.broadcast %cst_11 : f32 to vector<64x32xf32>
    %15 = arith.maximumf %13, %14 : vector<64x32xf32>
    %16 = arith.truncf %15 : vector<64x32xf32> to vector<64x32xbf16>
    %c0_12 = arith.constant 0 : index
    %c0_13 = arith.constant 0 : index
    %17 = vector.load %arg6[%c0_12, %c0_13] : memref<32x128xbf16, #tpu.memory_space<vmem>>, vector<32x128xbf16>
    %cst_14 = arith.constant dense<0.000000e+00> : vector<64x128xf32>
    %18 = tpu.matmul %16, %17, %cst_14 {dimension_numbers = #tpu.dot_dimension_numbers<[1], [0], [0], [1], [0, 0, 1, 1], [], []>} : vector<64x32xbf16>, vector<32x128xbf16>, vector<64x128xf32> -> vector<64x128xf32>
    %c0_15 = arith.constant 0 : index
    %c0_16 = arith.constant 0 : index
    %19 = vector.load %arg7[%c0_15, %c0_16] : memref<1x128xf32, #tpu.memory_space<vmem>>, vector<1x128xf32>
    %20 = vector.broadcast %19 : vector<1x128xf32> to vector<64x128xf32>
    %21 = arith.addf %18, %20 : vector<64x128xf32>
    %cst_17 = arith.constant dense<0xFF800000> : vector<64xf32>
    %22 = vector.multi_reduction <maximumf>, %21, %cst_17 [1] : vector<64x128xf32> to vector<64xf32>
    %23 = vector.shape_cast %22 : vector<64xf32> to vector<64x1xf32>
    %24 = vector.broadcast %23 : vector<64x1xf32> to vector<64x128xf32>
    %25 = arith.subf %21, %24 : vector<64x128xf32>
    %26 = math.exp %25 : vector<64x128xf32>
    %cst_18 = arith.constant dense<0.000000e+00> : vector<64xf32>
    %27 = vector.multi_reduction <add>, %26, %cst_18 [1] : vector<64x128xf32> to vector<64xf32>
    %28 = vector.shape_cast %27 : vector<64xf32> to vector<64x1xf32>
    %cst_19 = arith.constant 1.000000e+00 : f32
    %29 = vector.broadcast %cst_19 : f32 to vector<64x1xf32>
    %30 = arith.divf %29, %28 : vector<64x1xf32>
    %31 = vector.broadcast %30 : vector<64x1xf32> to vector<64x128xf32>
    %32 = arith.mulf %26, %31 : vector<64x128xf32>
    %c0_20 = arith.constant 0 : index
    %c0_21 = arith.constant 0 : index
    %33 = vector.load %arg8[%c0_20, %c0_21] : memref<64x128xf32, #tpu.memory_space<vmem>>, vector<64x128xf32>
    tpu.vector_store %arg8[%c0_20, %c0_21], %32 {strides = array<i32>} : memref<64x128xf32, #tpu.memory_space<vmem>>, vector<64x128xf32>,
    return
  }
  func.func @transform_0(%arg0: i32) -> (i32, i32) {
    %c0_i32 = arith.constant 0 : i32
    %c0_i32_0 = arith.constant 0 : i32
    return %arg0, %c0_i32 : i32, i32
  }
  func.func @transform_1(%arg0: i32) -> (i32, i32) {
    %c0_i32 = arith.constant 0 : i32
    %c0_i32_0 = arith.constant 0 : i32
    %c0_i32_1 = arith.constant 0 : i32
    return %c0_i32, %c0_i32_0 : i32, i32
  }
  func.func @transform_2(%arg0: i32) -> (i32, i32) {
    %c0_i32 = arith.constant 0 : i32
    %c0_i32_0 = arith.constant 0 : i32
    %c0_i32_1 = arith.constant 0 : i32
    return %c0_i32, %c0_i32_0 : i32, i32
  }
  func.func @transform_3(%arg0: i32) -> (i32, i32) {
    %c0_i32 = arith.constant 0 : i32
    %c0_i32_0 = arith.constant 0 : i32
    %c0_i32_1 = arith.constant 0 : i32
    return %c0_i32, %c0_i32_0 : i32, i32
  }
  func.func @transform_4(%arg0: i32) -> (i32, i32) {
    %c0_i32 = arith.constant 0 : i32
    %c0_i32_0 = arith.constant 0 : i32
    %c0_i32_1 = arith.constant 0 : i32
    return %c0_i32, %c0_i32_0 : i32, i32
  }
  func.func @transform_5(%arg0: i32) -> (i32, i32) {
    %c0_i32 = arith.constant 0 : i32
    %c0_i32_0 = arith.constant 0 : i32
    %c0_i32_1 = arith.constant 0 : i32
    return %c0_i32, %c0_i32_0 : i32, i32
  }
  func.func @transform_6(%arg0: i32) -> (i32, i32) {
    %c0_i32 = arith.constant 0 : i32
    %c0_i32_0 = arith.constant 0 : i32
    %c0_i32_1 = arith.constant 0 : i32
    return %c0_i32, %c0_i32_0 : i32, i32
  }
  func.func @transform_7(%arg0: i32) -> (i32, i32) {
    %c0_i32 = arith.constant 0 : i32
    %c0_i32_0 = arith.constant 0 : i32
    return %arg0, %c0_i32 : i32, i32
  }
}

</mosaic_0001>

<bundles_post_ra>
// kernel: tpu_custom_call.1
= control target key start
LH: loop header
LB: loop body
LE: loop exit
PB: predicated region body
PF: predicated region fallthrough
CT: control target
= control target key end

     0   :  { %s1038_s0 = inlined_call_operand.vmem [shape: bf16[64,256], index: 0, kind: input, shape index: {}]   ;;  %s1039_s1 = inlined_call_operand.vmem [shape: bf16[256,32], index: 1, kind: input, shape index: {}]   ;;  %s1040_s2 = inlined_call_operand.vmem [shape: f32[1,32], index: 2, kind: input, shape index: {}]   ;;  %s1041_s3 = inlined_call_operand.vmem [shape: bf16[32,32], index: 3, kind: input, shape index: {}]   ;;  %s1042_s4 = inlined_call_operand.vmem [shape: f32[1,32], index: 4, kind: input, shape index: {}]   ;;  %s1043_s5 = inlined_call_operand.vmem [shape: bf16[32,128], index: 5, kind: input, shape index: {}]   ;;  %s1044_s6 = inlined_call_operand.vmem [shape: f32[1,128], index: 6, kind: input, shape index: {}]   ;;  %s1045_s7 = inlined_call_operand.hbm [shape: f32[64,128], index: 7, kind: output, shape index: {}]  }
   0x1   :  { %v758_v0 = vld [vmem:[%s1039_s1 + $0x38] sm:$0xff]  ;;  %v757_v2 = vld [vmem:[%s1039_s1 + $0x30] sm:$0xff]  ;;  %v756_v4 = vld [vmem:[%s1039_s1 + $0x28] sm:$0xff] }
   0x2   :  { %v766_v1 = vld [vmem:[%s1039_s1 + $0x78] sm:$0xff]  ;;  %208 = vmatpush.bf16.msra.mxu0 %v758_v0  ;;  %v765_v3 = vld [vmem:[%s1039_s1 + $0x70] sm:$0xff]  ;;  %v764_v5 = vld [vmem:[%s1039_s1 + $0x68] sm:$0xff] }
   0x3   :  { %237 = vmatpush.bf16.msra.mxu1 %v766_v1 }
   0x6   :  { %209 = vmatpush.bf16.msra.mxu0 %v757_v2 }
   0x7   :  { %238 = vmatpush.bf16.msra.mxu1 %v765_v3 }
   0x8   :  { %12 = vsyncpa [#allocation3], 0  ;;  %v755_v6 = vld [vmem:[%s1039_s1 + $0x20] sm:$0xff]  ;;  %v754_v8 = vld [vmem:[%s1039_s1 + $0x18] sm:$0xff]  ;;  %vm298_vm0 = vcmask 261120   ;;  %s611_s29 = sshll.u32 %s1045_s7, 4  ;;  %s612_s29 = int_to_ptr.hbm [resolvable:$true] %s611_s29 }
   0x9   :  { %v763_v7 = vld [vmem:[%s1039_s1 + $0x60] sm:$0xff]  ;;  %v762_v9 = vld [vmem:[%s1039_s1 + $0x58] sm:$0xff]  ;;  %v753_v10 = vld [vmem:[%s1039_s1 + $0x10] sm:$0xff]  ;;  %s836_s30 = smov 128   ;;  %s837_s8 = smov 8  }
   0xa   :  { %210 = vmatpush.bf16.msra.mxu0 %v756_v4  ;;  %v761_v11 = vld [vmem:[%s1039_s1 + $0x50] sm:$0xff]  ;;  %v752_v12 = vld [vmem:[%s1039_s1 + $0x8] sm:$0xff]  ;;  %v751_v14 = vld [vmem:[%s1039_s1] sm:$0xff] }
   0xb   :  { %239 = vmatpush.bf16.msra.mxu1 %v764_v5  ;;  %v760_v13 = vld [vmem:[%s1039_s1 + $0x48] sm:$0xff]  ;;  %v759_v15 = vld [vmem:[%s1039_s1 + $0x40] sm:$0xff]  ;;  %v633_v22 = vld [vmem:[%s1038_s0 + $0x10] sm:$0xf] }
   0xc   :  { %v625_v16 = vld [vmem:[%s1038_s0] sm:$0xf]  ;;  %v744_v17 = vld [vmem:[%s1038_s0 + $0x4] sm:$0xf0]  ;;  %v743_v18 = vld [vmem:[%s1038_s0 + $0x4] sm:$0xf] }
   0xd   :  { %v627_v19 = vld [vmem:[%s1038_s0 + $0x8] sm:$0xf0]  ;;  %v626_v20 = vor.u32 %v744_v17, %v625_v16  ;;  %v746_v23 = vld [vmem:[%s1038_s0 + $0x14] sm:$0xf0]  ;;  %v745_v24 = vld [vmem:[%s1038_s0 + $0x14] sm:$0xf] }
   0xe   :  { %211 = vmatpush.bf16.msra.mxu0 %v755_v6  ;;  %v630_v21 = vor.u32 %v743_v18, %v627_v19  ;;  %v635_v25 = vld [vmem:[%s1038_s0 + $0x18] sm:$0xf0]  ;;  %v634_v26 = vor.u32 %v746_v23, %v633_v22  ;;  %v641_v28 = vld [vmem:[%s1038_s0 + $0x20] sm:$0xf]  ;;  %v748_v29 = vld [vmem:[%s1038_s0 + $0x24] sm:$0xf0] }
   0xf   :  { %240 = vmatpush.bf16.msra.mxu1 %v763_v7  ;;  %v638_v27 = vor.u32 %v745_v24, %v635_v25  ;;  %v747_v30 = vld [vmem:[%s1038_s0 + $0x24] sm:$0xf]  ;;  %v643_v31 = vld [vmem:[%s1038_s0 + $0x28] sm:$0xf0]  ;;  %v642_v32 = vor.u32 %v748_v29, %v641_v28  ;;  %v649_v34 = vld [vmem:[%s1038_s0 + $0x30] sm:$0xf] }
  0x10   :  { %v646_v33 = vor.u32 %v747_v30, %v643_v31  ;;  %v750_v35 = vld [vmem:[%s1038_s0 + $0x34] sm:$0xf0]  ;;  %v749_v36 = vld [vmem:[%s1038_s0 + $0x34] sm:$0xf]  ;;  %v651_v37 = vld [vmem:[%s1038_s0 + $0x38] sm:$0xf0] }
  0x11   :  { %v650_v38 = vor.u32 %v750_v35, %v649_v34  ;;  %v654_v39 = vor.u32 %v749_v36, %v651_v37  ;;  %v768_v40 = vld [vmem:[%s1041_s3 + $0x8] sm:$0xff]  ;;  %v767_v41 = vld [vmem:[%s1041_s3] sm:$0xff] }
  0x12   :  { %212 = vmatpush.bf16.msra.mxu0 %v754_v8  ;;  %317 = vmatpush.bf16.msra.mxu2 %v768_v40  ;;  %v774_v44 = vld [vmem:[%s1040_s2] ss:$0 sm:$0xff]  ;;  %v770_v23 = vld [vmem:[%s1043_s5 + $0x8] sm:$0xff] }
  0x13   :  { %241 = vmatpush.bf16.msra.mxu1 %v762_v9  ;;  %390 = vmatpush.bf16.msra.mxu3 %v770_v23  ;;  %v769_v24 = vld [vmem:[%s1043_s5] sm:$0xff] }
  0x16   :  { %213 = vmatpush.bf16.msra.mxu0 %v753_v10  ;;  %318 = vmatpush.bf16.msra.mxu2 %v767_v41 }
  0x17   :  { %242 = vmatpush.bf16.msra.mxu1 %v761_v11  ;;  %391 = vmatpush.bf16.msra.mxu3 %v769_v24 }
  0x1a   :  { %214 = vmatpush.bf16.msra.mxu0 %v752_v12 }
  0x1b   :  { %243 = vmatpush.bf16.msra.mxu1 %v760_v13 }
  0x1e   :  { %215 = vmatpush.bf16.msra.mxu0 %v751_v14 }
  0x1f   :  { %244 = vmatpush.bf16.msra.mxu1 %v759_v15 }
  0x21   :  { %216 = vmatmul.bf16.vlgmr.msra.gmra.mxu0 %v626_v20 }
  0x22   :  { %245 = vmatmul.bf16.vlgmr.msra.gmra.mxu1 %v630_v21 }
  0x31   :  { %221 = vmatmul.bf16.gmra.mxu0 %v634_v26  ;;  %v775_v26 = vld [vmem:[%s1042_s4] ss:$0 sm:$0xff] }
  0x32   :  { %250 = vmatmul.bf16.gmra.mxu1 %v638_v27 }
  0x41   :  { %226 = vmatmul.bf16.gmra.mxu0 %v642_v32 }
  0x42   :  { %255 = vmatmul.bf16.gmra.mxu1 %v646_v33 }
  0x51   :  { %231 = vmatmul.bf16.gmra.mxu0 %v650_v38 }
  0x52   :  { %260 = vmatmul.bf16.gmra.mxu1 %v654_v39 }
  0x9e   :  { %v217_v42 = vpop.f32.mrf.mxu0 }
  0x9f   :  { %v246_v43 = vpop.f32.mrf.mxu1  ;;  %v218_v45 = vadd.f32 %v774_v44, %v217_v42 }
  0xa1   :  { %v247_v48 = vadd.f32 %v246_v43, %v218_v45 }
  0xa3   :  { %v266_v51 = vmax.f32 %v247_v48, 0.0 }
  0xa6   :  { %v219_v46 = vpop.f32.mrf.mxu0 }
  0xa7   :  { %v248_v47 = vpop.f32.mrf.mxu1  ;;  %v220_v49 = vadd.f32 %v774_v44, %v219_v46 }
  0xa9   :  { %v249_v50 = vadd.f32 %v248_v47, %v220_v49 }
  0xab   :  { %v267_v52 = vmax.f32 %v249_v50, 0.0 }
  0xad   :  { %v274_v53 = vpack.c.bf16 %v267_v52, %v266_v51 }
  0xae   :  { %v222_v54 = vpop.f32.mrf.mxu0 }
  0xaf   :  { %v251_v55 = vpop.f32.mrf.mxu1  ;;  %727 = vmatmul.msk.bf16.vlgmr.msra.gmra.mxu2 %vm298_vm0, %v274_v53  ;;  %v223_v56 = vadd.f32 %v774_v44, %v222_v54  ;;  %v776_v54 = vld [vmem:[%s1044_s6] ss:$0 sm:$0xff]  ;;  %s835_s6 = smov [#allocation2]  }
  0xb0   :  { %s609_s26 = sshll.u32 %s835_s6, 4  ;;  %s610_s26 = int_to_ptr.vmem [resolvable:$true] %s609_s26 }
  0xb1   :  { %v252_v59 = vadd.f32 %v251_v55, %v223_v56 }
  0xb3   :  { %v268_v62 = vmax.f32 %v252_v59, 0.0 }
  0xb6   :  { %v224_v57 = vpop.f32.mrf.mxu0 }
  0xb7   :  { %v253_v58 = vpop.f32.mrf.mxu1  ;;  %v225_v60 = vadd.f32 %v774_v44, %v224_v57 }
  0xb9   :  { %v254_v61 = vadd.f32 %v253_v58, %v225_v60 }
  0xbb   :  { %v269_v63 = vmax.f32 %v254_v61, 0.0 }
  0xbd   :  { %v275_v0 = vpack.c.bf16 %v269_v63, %v268_v62 }
  0xbe   :  { %v227_v1 = vpop.f32.mrf.mxu0 }
  0xbf   :  { %v256_v2 = vpop.f32.mrf.mxu1  ;;  %728 = vmatmul.msk.bf16.gmra.mxu2 %vm298_vm0, %v275_v0  ;;  %v228_v3 = vadd.f32 %v774_v44, %v227_v1 }
  0xc1   :  { %v257_v6 = vadd.f32 %v256_v2, %v228_v3 }
  0xc3   :  { %v270_v9 = vmax.f32 %v257_v6, 0.0 }
  0xc6   :  { %v229_v4 = vpop.f32.mrf.mxu0 }
  0xc7   :  { %v258_v5 = vpop.f32.mrf.mxu1  ;;  %v230_v7 = vadd.f32 %v774_v44, %v229_v4 }
  0xc9   :  { %v259_v8 = vadd.f32 %v258_v5, %v230_v7 }
  0xcb   :  { %v271_v10 = vmax.f32 %v259_v8, 0.0 }
  0xcd   :  { %v276_v11 = vpack.c.bf16 %v271_v10, %v270_v9 }
  0xce   :  { %v232_v12 = vpop.f32.mrf.mxu0 }
  0xcf   :  { %v261_v13 = vpop.f32.mrf.mxu1  ;;  %729 = vmatmul.msk.bf16.gmra.mxu2 %vm298_vm0, %v276_v11  ;;  %v233_v14 = vadd.f32 %v774_v44, %v232_v12 }
  0xd1   :  { %v262_v16 = vadd.f32 %v261_v13, %v233_v14 }
  0xd3   :  { %v272_v20 = vmax.f32 %v262_v16, 0.0 }
  0xd6   :  { %v234_v15 = vpop.f32.mrf.mxu0 }
  0xd7   :  { %v235_v17 = vadd.f32 %v774_v44, %v234_v15  ;;  %v263_v18 = vpop.f32.mrf.mxu1 }
  0xd9   :  { %v264_v19 = vadd.f32 %v263_v18, %v235_v17 }
  0xdb   :  { %v273_v21 = vmax.f32 %v264_v19, 0.0 }
  0xdd   :  { %v277_v22 = vpack.c.bf16 %v273_v21, %v272_v20 }
  0xdf   :  { %730 = vmatmul.msk.bf16.gmra.mxu2 %vm298_vm0, %v277_v22 }
 0x132   :  { %v320_v25 = vpop.f32.mrf.mxu2 }
 0x133   :  { %v321_v27 = vadd.f32 %v775_v26, %v320_v25 }
 0x135   :  { %v340_v30 = vmax.f32 %v321_v27, 0.0 }
 0x13a   :  { %v322_v28 = vpop.f32.mrf.mxu2 }
 0x13b   :  { %v323_v29 = vadd.f32 %v775_v26, %v322_v28 }
 0x13d   :  { %v341_v31 = vmax.f32 %v323_v29, 0.0 }
 0x13f   :  { %v348_v32 = vpack.c.bf16 %v341_v31, %v340_v30 }
 0x141   :  { %739 = vmatmul.msk.bf16.vlgmr.msra.gmra.mxu3 %vm298_vm0, %v348_v32 }
 0x142   :  { %v325_v33 = vpop.f32.mrf.mxu2 }
 0x143   :  { %v326_v34 = vadd.f32 %v775_v26, %v325_v33 }
 0x145   :  { %v342_v37 = vmax.f32 %v326_v34, 0.0 }
 0x14a   :  { %v327_v35 = vpop.f32.mrf.mxu2 }
 0x14b   :  { %v328_v36 = vadd.f32 %v775_v26, %v327_v35 }
 0x14d   :  { %v343_v38 = vmax.f32 %v328_v36, 0.0 }
 0x14f   :  { %v349_v39 = vpack.c.bf16 %v343_v38, %v342_v37 }
 0x151   :  { %740 = vmatmul.msk.bf16.gmra.mxu3 %vm298_vm0, %v349_v39 }
 0x152   :  { %v330_v40 = vpop.f32.mrf.mxu2 }
 0x153   :  { %v331_v41 = vadd.f32 %v775_v26, %v330_v40 }
 0x155   :  { %v344_v44 = vmax.f32 %v331_v41, 0.0 }
 0x15a   :  { %v332_v42 = vpop.f32.mrf.mxu2 }
 0x15b   :  { %v333_v43 = vadd.f32 %v775_v26, %v332_v42 }
 0x15d   :  { %v345_v45 = vmax.f32 %v333_v43, 0.0 }
 0x15f   :  { %v350_v46 = vpack.c.bf16 %v345_v45, %v344_v44 }
 0x161   :  { %741 = vmatmul.msk.bf16.gmra.mxu3 %vm298_vm0, %v350_v46 }
 0x162   :  { %v335_v47 = vpop.f32.mrf.mxu2 }
 0x163   :  { %v336_v48 = vadd.f32 %v775_v26, %v335_v47 }
 0x165   :  { %v346_v51 = vmax.f32 %v336_v48, 0.0 }
 0x16a   :  { %v337_v49 = vpop.f32.mrf.mxu2 }
 0x16b   :  { %v338_v50 = vadd.f32 %v775_v26, %v337_v49 }
 0x16d   :  { %v347_v52 = vmax.f32 %v338_v50, 0.0 }
 0x16f   :  { %v351_v53 = vpack.c.bf16 %v347_v52, %v346_v51 }
 0x171   :  { %742 = vmatmul.msk.bf16.gmra.mxu3 %vm298_vm0, %v351_v53 }
 0x1c4   :  { %v393_v55 = vpop.f32.mrf.mxu3 }
 0x1c5   :  { %v394_v56 = vadd.f32 %v776_v54, %v393_v55 }
 0x1c7   :  { %413 = vmax.xlane.f32.xlu0 %v394_v56 }
 0x1cc   :  { %v395_v57 = vpop.f32.mrf.mxu3 }
 0x1cd   :  { %v396_v58 = vadd.f32 %v776_v54, %v395_v57 }
 0x1cf   :  { %415 = vmax.xlane.f32.xlu0 %v396_v58 }
 0x1d4   :  { %v398_v59 = vpop.f32.mrf.mxu3 }
 0x1d5   :  { %v399_v60 = vadd.f32 %v776_v54, %v398_v59 }
 0x1d7   :  { %417 = vmax.xlane.f32.xlu1 %v399_v60 }
 0x1dc   :  { %v400_v61 = vpop.f32.mrf.mxu3 }
 0x1dd   :  { %v401_v62 = vadd.f32 %v776_v54, %v400_v61 }
 0x1df   :  { %419 = vmax.xlane.f32.xlu1 %v401_v62 }
 0x1e4   :  { %v403_v63 = vpop.f32.mrf.mxu3 }
 0x1e5   :  { %v404_v0 = vadd.f32 %v776_v54, %v403_v63 }
 0x1e7   :  { %421 = vmax.xlane.f32.xlu2 %v404_v0 }
 0x1ec   :  { %v405_v1 = vpop.f32.mrf.mxu3 }
 0x1ed   :  { %v406_v2 = vadd.f32 %v776_v54, %v405_v1 }
 0x1ef   :  { %423 = vmax.xlane.f32.xlu2 %v406_v2 }
 0x1f4   :  { %v408_v3 = vpop.f32.mrf.mxu3 }
 0x1f5   :  { %v409_v4 = vadd.f32 %v776_v54, %v408_v3 }
 0x1f7   :  { %425 = vmax.xlane.f32.xlu0 %v409_v4 }
 0x1fc   :  { %v410_v5 = vpop.f32.mrf.mxu3 }
 0x1fd   :  { %v411_v6 = vadd.f32 %v776_v54, %v410_v5 }
 0x1ff   :  { %427 = vmax.xlane.f32.xlu1 %v411_v6 }
 0x23a   :  { %v414_v7 = vpop.xlane.xlu0 %413 }
 0x23b   :  { %v429_v8 = vsub.f32 %v394_v56, %v414_v7 }
 0x23d   :  { %v437_v9 = vmul.f32 1.442695, %v429_v8 }
 0x23f   :  { %777 = vpow2.f32 %v437_v9 }
 0x242   :  { %v416_v10 = vpop.xlane.xlu0 %415 }
 0x243   :  { %v430_v11 = vsub.f32 %v396_v58, %v416_v10 }
 0x245   :  { %v1003_v12 = vpop.eup %777  ;;  %v439_v13 = vmul.f32 1.442695, %v430_v11 }
 0x246   :  { %453 = vadd.xlane.f32.xlu2 %v1003_v12 }
 0x247   :  { %779 = vpow2.f32 %v439_v13 }
 0x24a   :  { %v418_v14 = vpop.xlane.xlu1 %417 }
 0x24b   :  { %v431_v15 = vsub.f32 %v399_v60, %v418_v14 }
 0x24d   :  { %v1006_v16 = vpop.eup %779  ;;  %v441_v17 = vmul.f32 1.442695, %v431_v15 }
 0x24e   :  { %455 = vadd.xlane.f32.xlu0 %v1006_v16 }
 0x24f   :  { %781 = vpow2.f32 %v441_v17 }
 0x252   :  { %v420_v18 = vpop.xlane.xlu1 %419 }
 0x253   :  { %v432_v19 = vsub.f32 %v401_v62, %v420_v18 }
 0x255   :  { %v1009_v20 = vpop.eup %781  ;;  %v443_v21 = vmul.f32 1.442695, %v432_v19 }
 0x256   :  { %457 = vadd.xlane.f32.xlu1 %v1009_v20 }
 0x257   :  { %783 = vpow2.f32 %v443_v21 }
 0x25a   :  { %v422_v22 = vpop.xlane.xlu2 %421 }
 0x25b   :  { %v433_v23 = vsub.f32 %v404_v0, %v422_v22 }
 0x25d   :  { %v1012_v24 = vpop.eup %783  ;;  %v445_v25 = vmul.f32 1.442695, %v433_v23 }
 0x25e   :  { %459 = vadd.xlane.f32.xlu2 %v1012_v24 }
 0x25f   :  { %785 = vpow2.f32 %v445_v25 }
 0x262   :  { %v424_v26 = vpop.xlane.xlu2 %423 }
 0x263   :  { %v434_v27 = vsub.f32 %v406_v2, %v424_v26 }
 0x265   :  { %v1015_v28 = vpop.eup %785  ;;  %v447_v29 = vmul.f32 1.442695, %v434_v27 }
 0x266   :  { %461 = vadd.xlane.f32.xlu0 %v1015_v28 }
 0x267   :  { %787 = vpow2.f32 %v447_v29 }
 0x26a   :  { %v426_v30 = vpop.xlane.xlu0 %425 }
 0x26b   :  { %v435_v31 = vsub.f32 %v409_v4, %v426_v30 }
 0x26d   :  { %v1018_v32 = vpop.eup %787  ;;  %v449_v33 = vmul.f32 1.442695, %v435_v31 }
 0x26e   :  { %463 = vadd.xlane.f32.xlu1 %v1018_v32 }
 0x26f   :  { %789 = vpow2.f32 %v449_v33 }
 0x272   :  { %v428_v34 = vpop.xlane.xlu1 %427 }
 0x273   :  { %v436_v35 = vsub.f32 %v411_v6, %v428_v34 }
 0x275   :  { %v1021_v36 = vpop.eup %789  ;;  %v451_v37 = vmul.f32 1.442695, %v436_v35 }
 0x276   :  { %465 = vadd.xlane.f32.xlu2 %v1021_v36 }
 0x277   :  { %791 = vpow2.f32 %v451_v37 }
 0x27d   :  { %v1024_v38 = vpop.eup %791 }
 0x27e   :  { %467 = vadd.xlane.f32.xlu0 %v1024_v38 }
 0x2b9   :  { %v454_v39 = vpop.xlane.xlu2 %453 }
 0x2ba   :  { %793 = vrcp.f32 %v454_v39  ;;  %v480_v44 = vand.u32 2147483648, %v454_v39  ;;  %v478_v46 = vand.u32 2147483647, %v454_v39  ;;  %vm474_vm2 = vweird.f32 %v454_v39 }
 0x2bc   :  { %v481_v49 = vor.u32 1.1754944e-38, %v480_v44  ;;  %vm479_vm4 = vcmp.eq.f32.partialorder %v478_v46, 8.507059e+37 }
 0x2c0   :  { %v794_v40 = vpop.eup %793 }
 0x2c1   :  { %v470_v41 = vmul.f32 %v794_v40, %v454_v39  ;;  %v456_v42 = vpop.xlane.xlu0 %455  ;;  %vm475_vm1 = vweird.f32 %v794_v40 }
 0x2c2   :  { %795 = vrcp.f32 %v456_v42  ;;  %vm476_vm3 = vmor %vm474_vm2, %vm475_vm1  ;;  %v495_v56 = vand.u32 2147483648, %v456_v42  ;;  %v493_v58 = vand.u32 2147483647, %v456_v42  ;;  %vm489_vm6 = vweird.f32 %v456_v42 }
 0x2c3   :  { %v471_v43 = vsub.f32 1.0, %v470_v41 }
 0x2c4   :  { %v496_v61 = vor.u32 1.1754944e-38, %v495_v56  ;;  %vm494_vm8 = vcmp.eq.f32.partialorder %v493_v58, 8.507059e+37 }
 0x2c5   :  { %v472_v45 = vmul.f32 %v794_v40, %v471_v43 }
 0x2c7   :  { %v473_v47 = vadd.f32 %v794_v40, %v472_v45 }
 0x2c8   :  { %v796_v48 = vpop.eup %795 }
 0x2c9   :  { %v477_v50 = vsel %vm476_vm3, %v794_v40, %v473_v47  ;;  %v485_v51 = vmul.f32 %v796_v48, %v456_v42  ;;  %v458_v52 = vpop.xlane.xlu1 %457  ;;  %vm490_vm5 = vweird.f32 %v796_v48 }
 0x2ca   :  { %v482_v53 = vsel %vm479_vm4, %v481_v49, %v477_v50  ;;  %797 = vrcp.f32 %v458_v52  ;;  %vm491_vm7 = vmor %vm489_vm6, %vm490_vm5  ;;  %v510_v4 = vand.u32 2147483648, %v458_v52  ;;  %v508_v6 = vand.u32 2147483647, %v458_v52 }
 0x2cb   :  { %v589_v54 = vmul.f32 %v1003_v12, %v482_v53  ;;  %v486_v55 = vsub.f32 1.0, %v485_v51  ;;  %vm504_vm10 = vweird.f32 %v458_v52 }
 0x2cc   :  { %v511_v9 = vor.u32 1.1754944e-38, %v510_v4  ;;  %vm509_vm12 = vcmp.eq.f32.partialorder %v508_v6, 8.507059e+37 }
 0x2cd   :  { %597 = vst [vmem:[#allocation2] sm:$0xff] %v589_v54  ;;  %v487_v57 = vmul.f32 %v796_v48, %v486_v55 }
 0x2cf   :  { %v488_v59 = vadd.f32 %v796_v48, %v487_v57 }
 0x2d0   :  { %v798_v60 = vpop.eup %797 }
 0x2d1   :  { %v492_v62 = vsel %vm491_vm7, %v796_v48, %v488_v59  ;;  %v500_v63 = vmul.f32 %v798_v60, %v458_v52  ;;  %v460_v0 = vpop.xlane.xlu2 %459  ;;  %vm505_vm9 = vweird.f32 %v798_v60 }
 0x2d2   :  { %v497_v1 = vsel %vm494_vm8, %v496_v61, %v492_v62  ;;  %799 = vrcp.f32 %v460_v0  ;;  %vm506_vm11 = vmor %vm504_vm10, %vm505_vm9  ;;  %v523_v18 = vand.u32 2147483647, %v460_v0  ;;  %vm519_vm14 = vweird.f32 %v460_v0 }
 0x2d3   :  { %v590_v2 = vmul.f32 %v1006_v16, %v497_v1  ;;  %v501_v3 = vsub.f32 1.0, %v500_v63  ;;  %v525_v16 = vand.u32 2147483648, %v460_v0 }
 0x2d4   :  { %vm524_vm0 = vcmp.eq.f32.partialorder %v523_v18, 8.507059e+37 }
 0x2d5   :  { %598 = vst [vmem:[#allocation2 + $0x8] sm:$0xff] %v590_v2  ;;  %v502_v5 = vmul.f32 %v798_v60, %v501_v3  ;;  %v526_v22 = vor.u32 1.1754944e-38, %v525_v16 }
 0x2d7   :  { %v503_v7 = vadd.f32 %v798_v60, %v502_v5 }
 0x2d8   :  { %v800_v8 = vpop.eup %799 }
 0x2d9   :  { %v507_v10 = vsel %vm506_vm11, %v798_v60, %v503_v7  ;;  %v515_v11 = vmul.f32 %v800_v8, %v460_v0  ;;  %v462_v12 = vpop.xlane.xlu0 %461  ;;  %vm520_vm13 = vweird.f32 %v800_v8 }
 0x2da   :  { %v512_v13 = vsel %vm509_vm12, %v511_v9, %v507_v10  ;;  %801 = vrcp.f32 %v462_v12  ;;  %vm521_vm15 = vmor %vm519_vm14, %vm520_vm13  ;;  %v540_v30 = vand.u32 2147483648, %v462_v12  ;;  %v538_v33 = vand.u32 2147483647, %v462_v12 }
 0x2db   :  { %v591_v14 = vmul.f32 %v1009_v20, %v512_v13  ;;  %v516_v15 = vsub.f32 1.0, %v515_v11  ;;  %vm534_vm2 = vweird.f32 %v462_v12 }
 0x2dc   :  { %v541_v37 = vor.u32 1.1754944e-38, %v540_v30  ;;  %vm539_vm4 = vcmp.eq.f32.partialorder %v538_v33, 8.507059e+37 }
 0x2dd   :  { %599 = vst [vmem:[#allocation2 + $0x10] sm:$0xff] %v591_v14  ;;  %v517_v17 = vmul.f32 %v800_v8, %v516_v15 }
 0x2df   :  { %v518_v19 = vadd.f32 %v800_v8, %v517_v17 }
 0x2e0   :  { %v802_v21 = vpop.eup %801 }
 0x2e1   :  { %v522_v23 = vsel %vm521_vm15, %v800_v8, %v518_v19  ;;  %v530_v25 = vmul.f32 %v802_v21, %v462_v12  ;;  %v464_v26 = vpop.xlane.xlu1 %463  ;;  %vm535_vm1 = vweird.f32 %v802_v21 }
 0x2e2   :  { %v527_v27 = vsel %vm524_vm0, %v526_v22, %v522_v23  ;;  %803 = vrcp.f32 %v464_v26  ;;  %vm536_vm3 = vmor %vm534_vm2, %vm535_vm1  ;;  %v555_v44 = vand.u32 2147483648, %v464_v26  ;;  %v553_v46 = vand.u32 2147483647, %v464_v26 }
 0x2e3   :  { %v592_v29 = vmul.f32 %v1012_v24, %v527_v27  ;;  %v531_v20 = vsub.f32 1.0, %v530_v25  ;;  %vm549_vm6 = vweird.f32 %v464_v26 }
 0x2e4   :  { %v556_v49 = vor.u32 1.1754944e-38, %v555_v44  ;;  %vm554_vm8 = vcmp.eq.f32.partialorder %v553_v46, 8.507059e+37 }
 0x2e5   :  { %600 = vst [vmem:[#allocation2 + $0x18] sm:$0xff] %v592_v29  ;;  %v532_v31 = vmul.f32 %v802_v21, %v531_v20 }
 0x2e7   :  { %v533_v34 = vadd.f32 %v802_v21, %v532_v31 }
 0x2e8   :  { %v804_v35 = vpop.eup %803 }
 0x2e9   :  { %v537_v39 = vsel %vm536_vm3, %v802_v21, %v533_v34  ;;  %v545_v40 = vmul.f32 %v804_v35, %v464_v26  ;;  %v466_v41 = vpop.xlane.xlu2 %465  ;;  %vm550_vm5 = vweird.f32 %v804_v35 }
 0x2ea   :  { %v542_v42 = vsel %vm539_vm4, %v541_v37, %v537_v39  ;;  %805 = vrcp.f32 %v466_v41  ;;  %vm551_vm7 = vmor %vm549_vm6, %vm550_vm5  ;;  %v570_v55 = vand.u32 2147483648, %v466_v41  ;;  %v568_v57 = vand.u32 2147483647, %v466_v41 }
 0x2eb   :  { %v593_v43 = vmul.f32 %v1015_v28, %v542_v42  ;;  %v546_v24 = vsub.f32 1.0, %v545_v40  ;;  %vm564_vm10 = vweird.f32 %v466_v41 }
 0x2ec   :  { %v571_v60 = vor.u32 1.1754944e-38, %v570_v55  ;;  %vm569_vm12 = vcmp.eq.f32.partialorder %v568_v57, 8.507059e+37 }
 0x2ed   :  { %601 = vst [vmem:[#allocation2 + $0x20] sm:$0xff] %v593_v43  ;;  %v547_v45 = vmul.f32 %v804_v35, %v546_v24 }
 0x2ef   :  { %v548_v47 = vadd.f32 %v804_v35, %v547_v45 }
 0x2f0   :  { %v806_v48 = vpop.eup %805 }
 0x2f1   :  { %v552_v50 = vsel %vm551_vm7, %v804_v35, %v548_v47  ;;  %v560_v51 = vmul.f32 %v806_v48, %v466_v41  ;;  %v468_v52 = vpop.xlane.xlu0 %467  ;;  %vm565_vm9 = vweird.f32 %v806_v48 }
 0x2f2   :  { %v557_v53 = vsel %vm554_vm8, %v556_v49, %v552_v50  ;;  %807 = vrcp.f32 %v468_v52  ;;  %vm566_vm11 = vmor %vm564_vm10, %vm565_vm9  ;;  %v585_v2 = vand.u32 2147483648, %v468_v52  ;;  %v583_v3 = vand.u32 2147483647, %v468_v52 }
 0x2f3   :  { %v594_v54 = vmul.f32 %v1018_v32, %v557_v53  ;;  %v561_v28 = vsub.f32 1.0, %v560_v51  ;;  %vm579_vm14 = vweird.f32 %v468_v52 }
 0x2f4   :  { %v586_v5 = vor.u32 1.1754944e-38, %v585_v2  ;;  %vm584_vm0 = vcmp.eq.f32.partialorder %v583_v3, 8.507059e+37 }
 0x2f5   :  { %602 = vst [vmem:[#allocation2 + $0x28] sm:$0xff] %v594_v54  ;;  %v562_v56 = vmul.f32 %v806_v48, %v561_v28 }
 0x2f7   :  { %v563_v58 = vadd.f32 %v806_v48, %v562_v56 }
 0x2f8   :  { %v808_v59 = vpop.eup %807 }
 0x2f9   :  { %v567_v61 = vsel %vm566_vm11, %v806_v48, %v563_v58  ;;  %v575_v62 = vmul.f32 %v808_v59, %v468_v52  ;;  %vm580_vm13 = vweird.f32 %v808_v59 }
 0x2fa   :  { %v572_v63 = vsel %vm569_vm12, %v571_v60, %v567_v61  ;;  %vm581_vm15 = vmor %vm579_vm14, %vm580_vm13 }
 0x2fb   :  { %v595_v0 = vmul.f32 %v1021_v36, %v572_v63  ;;  %v576_v1 = vsub.f32 1.0, %v575_v62 }
 0x2fd   :  { %603 = vst [vmem:[#allocation2 + $0x30] sm:$0xff] %v595_v0  ;;  %v577_v32 = vmul.f32 %v808_v59, %v576_v1 }
 0x2ff   :  { %v578_v4 = vadd.f32 %v808_v59, %v577_v32 }
 0x301   :  { %v582_v6 = vsel %vm581_vm15, %v808_v59, %v578_v4 }
 0x302   :  { %v587_v7 = vsel %vm584_vm0, %v586_v5, %v582_v6 }
 0x303   :  { %v596_v36 = vmul.f32 %v1024_v38, %v587_v7 }
 0x305   :  { %604 = vst [vmem:[#allocation2 + $0x38] sm:$0xff] %v596_v36 }
 0x306   :  { %617 = dma.vmem_to_hbm [thread:$0]  %s610_s26, 1024, %s612_s29, [#allocation3], %s836_s30, %s836_s30, %s837_s8  }
 0x307   :  { %833 = dma.done.wait [#allocation3], 1024  }
 0x308   :  { %834 = vsyncadd [#allocation3], 4294966272 }
 0x309   :  { %622 = vsyncpa [#allocation3], 1 }

</bundles_post_ra>
